<compile_context>
chip_gen: v7x
topology: tpu7x:2x2x1
jax: 0.10.0
libtpu: 0.0.40
codegen_flags: <defaults>
</compile_context>

<pallas_src>
import math

import jax
import jax.numpy as jnp
from jax.experimental import pallas as pl
from jax.experimental.pallas import tpu as pltpu


def _pos_encoding_kernel(x_ref, head_ref, pe_tail_ref, o_ref):
    # x_ref:       (bt, n*d)    flattened input rows for this batch tile
    # head_ref:    (1, d)       cls_token + pe[0]   (constant, resident across grid)
    # pe_tail_ref: (1, n*d)     pe[1:] flattened    (constant, resident across grid)
    # o_ref:       (bt, seq*d)  flattened output rows, seq = n + 1
    bt = x_ref.shape[0]
    d = head_ref.shape[-1]
    # Two direct stores -- no in-register concatenate, no full-tile temporary.
    o_ref[:, :d] = jnp.broadcast_to(head_ref[...], (bt, d))        # cls + pe[0]
    o_ref[:, d:] = x_ref[...] + pe_tail_ref[...]                   # x + pe[1:]


def _chip_budgets():
    """Per-block byte budget and scoped-VMEM limit sized to the local chip."""
    try:
        vmem = pltpu.get_tpu_info().vmem_capacity_bytes
    except Exception:
        vmem = 64 << 20  # conservative default: v7x per-TC VMEM
    # Double-buffered input + output blocks (~4x block budget) plus the resident
    # constants must fit comfortably inside scoped VMEM.
    block_budget = max(2 << 20, min(12 << 20, vmem // 10))   # ~12 MiB v5e/v6e, ~6 MiB v7x
    vmem_limit = int(min(vmem * 3 // 4, 96 << 20))           # 96 MiB v5e/v6e, 48 MiB v7x
    return block_budget, vmem_limit


def positional_encoding_forward(x, cls_token, pe, *, batch_tile=None):
    """x: (b, n, d); cls_token: (1, 1, d); pe: (1, n+1, d) -> (b, n+1, d).

    Pure HBM-streaming kernel; works for f32 or bf16 inputs (casting the model to
    bf16 upstream halves HBM bytes and thus wall time on all generations).
    """
    b, n, d = x.shape
    seq = n + 1
    assert cls_token.shape == (1, 1, d)
    assert pe.shape == (1, seq, d)

    # Wrapper-side constant folding (tiny parameter math, done once by XLA):
    head = (cls_token[:, 0, :] + pe[:, 0, :]).astype(x.dtype)      # (1, d)
    pe_tail = pe[:, 1:, :].reshape(1, n * d).astype(x.dtype)       # (1, n*d)
    x2 = x.reshape(b, n * d)                                       # contiguous -> free view

    block_budget, vmem_limit = _chip_budgets()

    if batch_tile is None:
        row_bytes = seq * d * x.dtype.itemsize                     # output rows dominate
        max_rows = max(1, block_budget // row_bytes)
        if b <= 8:
            batch_tile = b                                         # too small to split on sublanes
        else:
            # >= 2 grid steps whenever possible (lets v7x stream on both TCs),
            # sublane(8)-aligned, and never above the VMEM budget after rounding.
            target = min(max_rows, pl.cdiv(b, 2))
            batch_tile = (target // 8) * 8
            if batch_tile == 0:
                batch_tile = min(8, b)                             # minimum aligned tile
    grid_b = pl.cdiv(b, batch_tile)

    itemsize = x.dtype.itemsize
    cost = pl.CostEstimate(
        flops=b * seq * d,                                          # one add per output element
        transcendentals=0,
        bytes_accessed=(b * n * d + b * seq * d + seq * d) * itemsize,
    )

    def _build(single_buffer_consts):
        if single_buffer_consts:
            const_kwargs = dict(pipeline_mode=pl.Buffered(buffer_count=1))
        else:
            const_kwargs = {}
        return pl.pallas_call(
            _pos_encoding_kernel,
            out_shape=jax.ShapeDtypeStruct((b, seq * d), x.dtype),
            grid_spec=pltpu.PrefetchScalarGridSpec(
                num_scalar_prefetch=0,
                grid=(grid_b,),
                in_specs=[
                    pl.BlockSpec((batch_tile, n * d), lambda i: (i, 0)),         # x (pipelined)
                    pl.BlockSpec((1, d), lambda i: (0, 0), **const_kwargs),      # cls + pe[0]
                    pl.BlockSpec((1, n * d), lambda i: (0, 0), **const_kwargs),  # pe tail
                ],
                out_specs=pl.BlockSpec((batch_tile, seq * d), lambda i: (i, 0)),
            ),
            compiler_params=pltpu.CompilerParams(
                dimension_semantics=("parallel",),   # shards batch tiles over v7x's 2 TCs
                vmem_limit_bytes=vmem_limit,
            ),
            cost_estimate=cost,
        )

    try:
        out_flat = _build(single_buffer_consts=True)(x2, head, pe_tail)
    except Exception:
        # pipeline_mode=pl.Buffered(1) unsupported on this jax version: fall back to
        # default double-buffered constants (identical numerics, slightly more VMEM).
        out_flat = _build(single_buffer_consts=False)(x2, head, pe_tail)

    return out_flat.reshape(b, seq, d)


def build_pe_table(seq_len_plus_one, d_model, dtype=jnp.float32):
    """Sinusoidal table identical to the PyTorch __init__ construction (odd d handled)."""
    position = jnp.arange(seq_len_plus_one, dtype=jnp.float32)[:, None]          # (S, 1)
    div_term = jnp.exp(
        jnp.arange(0, d_model, 2, dtype=jnp.float32) * (-math.log(10000.0) / d_model)
    )                                                                             # (ceil(d/2),)
    angles = position * div_term                                                  # (S, ceil(d/2))
    pe = jnp.zeros((seq_len_plus_one, d_model), dtype=jnp.float32)
    pe = pe.at[:, 0::2].set(jnp.sin(angles))
    pe = pe.at[:, 1::2].set(jnp.cos(angles)[:, : d_model // 2])
    return pe[None, :, :].astype(dtype)                                           # (1, S, d)


if __name__ == "__main__":
    # Small shapes consistent with the module: batch=2, seq n=8, d_model=32
    b, n, d_model = 2, 8, 32
    seq_plus_one = n + 1

    key = jax.random.PRNGKey(0)
    k_x, k_cls = jax.random.split(key)

    x = jax.random.normal(k_x, (b, n, d_model), dtype=jnp.float32)
    # nn.Parameter(torch.rand(1, 1, d_model)) -> uniform [0, 1)
    cls_token = jax.random.uniform(k_cls, (1, 1, d_model), dtype=jnp.float32)
    pe = build_pe_table(seq_plus_one, d_model)

    out = jax.block_until_ready(positional_encoding_forward(x, cls_token, pe))

    # Reference check in plain JAX (eval-mode dropout == identity)
    ref = jnp.concatenate([jnp.broadcast_to(cls_token, (b, 1, d_model)), x], axis=1) + pe
    assert out.shape == (b, seq_plus_one, d_model)
    assert jnp.allclose(out, ref, atol=1e-6), "mismatch vs reference"

    print("KERNEL_OK")
</pallas_src>

<mosaic_0001>
module attributes {stable_mosaic.version = 11 : i64} {
  func.func @_pos_encoding_kernel(%arg0: i32, %arg1: memref<2x256xf32, #tpu.memory_space<vmem>>, %arg2: memref<1x32xf32, #tpu.memory_space<vmem>>, %arg3: memref<1x256xf32, #tpu.memory_space<vmem>>, %arg4: memref<2x288xf32, #tpu.memory_space<vmem>>) attributes {dimension_semantics = [#tpu.dimension_semantics<parallel>], iteration_bounds = array<i64: 1>, scalar_prefetch = 0 : i64, scratch_operands = 0 : i64, tpu.core_type = #tpu.core_type<tc>, window_params = [{transform_indices = @transform_0, window_bounds = array<i64: 2, 256>}, {pipeline_mode = #tpu.pipeline_mode<synchronous>, transform_indices = @transform_1, window_bounds = array<i64: 1, 32>}, {pipeline_mode = #tpu.pipeline_mode<synchronous>, transform_indices = @transform_2, window_bounds = array<i64: 1, 256>}, {transform_indices = @transform_3, window_bounds = array<i64: 2, 288>}]} {
    %c0 = arith.constant 0 : index
    %c0_0 = arith.constant 0 : index
    %0 = vector.load %arg2[%c0, %c0_0] : memref<1x32xf32, #tpu.memory_space<vmem>>, vector<1x32xf32>
    %1 = vector.shape_cast %0 : vector<1x32xf32> to vector<1x32xf32>
    %2 = vector.broadcast %1 : vector<1x32xf32> to vector<2x32xf32>
    %c0_1 = arith.constant 0 : index
    %c0_2 = arith.constant 0 : index
    %3 = vector.load %arg4[%c0_1, %c0_2] : memref<2x288xf32, #tpu.memory_space<vmem>>, vector<2x32xf32>
    tpu.vector_store %arg4[%c0_1, %c0_2], %2 {strides = array<i32>} : memref<2x288xf32, #tpu.memory_space<vmem>>, vector<2x32xf32>,
    %c0_3 = arith.constant 0 : index
    %c0_4 = arith.constant 0 : index
    %4 = vector.load %arg1[%c0_3, %c0_4] : memref<2x256xf32, #tpu.memory_space<vmem>>, vector<2x256xf32>
    %c0_5 = arith.constant 0 : index
    %c0_6 = arith.constant 0 : index
    %5 = vector.load %arg3[%c0_5, %c0_6] : memref<1x256xf32, #tpu.memory_space<vmem>>, vector<1x256xf32>
    %6 = vector.broadcast %5 : vector<1x256xf32> to vector<2x256xf32>
    %7 = arith.addf %4, %6 : vector<2x256xf32>
    %c0_7 = arith.constant 0 : index
    %c32 = arith.constant 32 : index
    %8 = vector.load %arg4[%c0_7, %c32] : memref<2x288xf32, #tpu.memory_space<vmem>>, vector<2x256xf32>
    tpu.vector_store %arg4[%c0_7, %c32], %7 {strides = array<i32>} : memref<2x288xf32, #tpu.memory_space<vmem>>, vector<2x256xf32>,
    return
  }
  func.func @transform_0(%arg0: i32) -> (i32, i32) {
    %c0_i32 = arith.constant 0 : i32
    %c0_i32_0 = arith.constant 0 : i32
    return %arg0, %c0_i32 : i32, i32
  }
  func.func @transform_1(%arg0: i32) -> (i32, i32) {
    %c0_i32 = arith.constant 0 : i32
    %c0_i32_0 = arith.constant 0 : i32
    %c0_i32_1 = arith.constant 0 : i32
    return %c0_i32, %c0_i32_0 : i32, i32
  }
  func.func @transform_2(%arg0: i32) -> (i32, i32) {
    %c0_i32 = arith.constant 0 : i32
    %c0_i32_0 = arith.constant 0 : i32
    %c0_i32_1 = arith.constant 0 : i32
    return %c0_i32, %c0_i32_0 : i32, i32
  }
  func.func @transform_3(%arg0: i32) -> (i32, i32) {
    %c0_i32 = arith.constant 0 : i32
    %c0_i32_0 = arith.constant 0 : i32
    return %arg0, %c0_i32 : i32, i32
  }
}

module attributes {stable_mosaic.version = 11 : i64} {
  func.func @_pos_encoding_kernel(%arg0: i32, %arg1: memref<2x256xf32, #tpu.memory_space<vmem>>, %arg2: memref<1x32xf32, #tpu.memory_space<vmem>>, %arg3: memref<1x256xf32, #tpu.memory_space<vmem>>, %arg4: memref<2x288xf32, #tpu.memory_space<vmem>>) attributes {dimension_semantics = [#tpu.dimension_semantics<parallel>], iteration_bounds = array<i64: 1>, scalar_prefetch = 0 : i64, scratch_operands = 0 : i64, tpu.core_type = #tpu.core_type<tc>, window_params = [{transform_indices = @transform_0, window_bounds = array<i64: 2, 256>}, {pipeline_mode = #tpu.pipeline_mode<synchronous>, transform_indices = @transform_1, window_bounds = array<i64: 1, 32>}, {pipeline_mode = #tpu.pipeline_mode<synchronous>, transform_indices = @transform_2, window_bounds = array<i64: 1, 256>}, {transform_indices = @transform_3, window_bounds = array<i64: 2, 288>}]} {
    %c0 = arith.constant 0 : index
    %c0_0 = arith.constant 0 : index
    %0 = vector.load %arg2[%c0, %c0_0] : memref<1x32xf32, #tpu.memory_space<vmem>>, vector<1x32xf32>
    %1 = vector.shape_cast %0 : vector<1x32xf32> to vector<1x32xf32>
    %2 = vector.broadcast %1 : vector<1x32xf32> to vector<2x32xf32>
    %c0_1 = arith.constant 0 : index
    %c0_2 = arith.constant 0 : index
    %3 = vector.load %arg4[%c0_1, %c0_2] : memref<2x288xf32, #tpu.memory_space<vmem>>, vector<2x32xf32>
    tpu.vector_store %arg4[%c0_1, %c0_2], %2 {strides = array<i32>} : memref<2x288xf32, #tpu.memory_space<vmem>>, vector<2x32xf32>,
    %c0_3 = arith.constant 0 : index
    %c0_4 = arith.constant 0 : index
    %4 = vector.load %arg1[%c0_3, %c0_4] : memref<2x256xf32, #tpu.memory_space<vmem>>, vector<2x256xf32>
    %c0_5 = arith.constant 0 : index
    %c0_6 = arith.constant 0 : index
    %5 = vector.load %arg3[%c0_5, %c0_6] : memref<1x256xf32, #tpu.memory_space<vmem>>, vector<1x256xf32>
    %6 = vector.broadcast %5 : vector<1x256xf32> to vector<2x256xf32>
    %7 = arith.addf %4, %6 : vector<2x256xf32>
    %c0_7 = arith.constant 0 : index
    %c32 = arith.constant 32 : index
    %8 = vector.load %arg4[%c0_7, %c32] : memref<2x288xf32, #tpu.memory_space<vmem>>, vector<2x256xf32>
    tpu.vector_store %arg4[%c0_7, %c32], %7 {strides = array<i32>} : memref<2x288xf32, #tpu.memory_space<vmem>>, vector<2x256xf32>,
    return
  }
  func.func @transform_0(%arg0: i32) -> (i32, i32) {
    %c0_i32 = arith.constant 0 : i32
    %c0_i32_0 = arith.constant 0 : i32
    return %arg0, %c0_i32 : i32, i32
  }
  func.func @transform_1(%arg0: i32) -> (i32, i32) {
    %c0_i32 = arith.constant 0 : i32
    %c0_i32_0 = arith.constant 0 : i32
    %c0_i32_1 = arith.constant 0 : i32
    return %c0_i32, %c0_i32_0 : i32, i32
  }
  func.func @transform_2(%arg0: i32) -> (i32, i32) {
    %c0_i32 = arith.constant 0 : i32
    %c0_i32_0 = arith.constant 0 : i32
    %c0_i32_1 = arith.constant 0 : i32
    return %c0_i32, %c0_i32_0 : i32, i32
  }
  func.func @transform_3(%arg0: i32) -> (i32, i32) {
    %c0_i32 = arith.constant 0 : i32
    %c0_i32_0 = arith.constant 0 : i32
    return %arg0, %c0_i32 : i32, i32
  }
}

</mosaic_0001>

<bundles_post_ra>
// kernel: tpu_custom_call.1
= control target key start
LH: loop header
LB: loop body
LE: loop exit
PB: predicated region body
PF: predicated region fallthrough
CT: control target
= control target key end

     0   :  { %8 = vsyncpa [#allocation3], 0  ;;  %s192_s0 = inlined_call_operand.hbm [shape: f32[2,256], index: 0, kind: input, shape index: {}]   ;;  %s193_s1 = inlined_call_operand.vmem [shape: f32[1,32], index: 1, kind: input, shape index: {}]   ;;  %s194_s2 = inlined_call_operand.vmem [shape: f32[1,256], index: 2, kind: input, shape index: {}]   ;;  %s195_s3 = inlined_call_operand.hbm [shape: f32[2,288], index: 3, kind: output, shape index: {}]  }
   0x1   :  { %9 = vsyncpa [#allocation4], 0  ;;  %s138_s12 = smov [#allocation2]   ;;  %s90_s16 = scalar_lea.hbm %s192_s0, 64 }
   0x2   :  { %s16_s13 = sshll.u32 %s138_s12, 4  ;;  %p91_p0 = scmp.ne.s32.totalorder %s192_s0, %s90_s16  ;;  %s17_s13 = int_to_ptr.vmem [resolvable:$true] %s16_s13 }
   0x3   :  { %p94_p1 = scmp.lt.u32.totalorder %s90_s16, %s192_s0 }
   0x5   :  { %p96_p2 = pnand %p94_p1, %p91_p0 }
   0x7   :  { %99 = shalt.err (!%p96_p2)
}
   0x8   :  { %s100_s21 = scalar_lea.vmem %s17_s13, 64  ;;  %p105_p4 = scmp.lt.s32.totalorder %s17_s13, %s17_s13 }
   0x9   :  { %p101_p3 = scmp.ne.s32.totalorder %s17_s13, %s100_s21  ;;  %p106_p5 = scmp.lt.s32.totalorder %s100_s21, %s100_s21 }
   0xb   :  { %p107_p6 = por %p106_p5, %p105_p4 }
   0xd   :  { %p108_p7 = pnand %p107_p6, %p101_p3 }
   0xf   :  { %111 = shalt.err (!%p108_p7)
}
  0x10   :  { %19 = dma.hbm_to_vmem [thread:$0]  %s192_s0, 64, %s17_s13, [#allocation3]  }
  0x11   :  { %134 = dma.done.wait [#allocation3], 64  }
  0x12   :  { %135 = vsyncadd [#allocation3], 4294967232  ;;  %v39_v0 = vlaneseq  ;;  %v139_v1 = vmov 1983009808   ;;  %vm34_vm0 = vcmask 254976   ;;  %s140_s0 = smov 32  }
  0x13   :  { %v49_v2 = vunpack.c.l.s4 %v139_v1  ;;  %v37_v7 = vld [vmem:[%s194_s2] sm:$0x3]  ;;  %vm64_vm1 = vcmask 1041664   ;;  %vm65_vm2 = vcmask 1043458   ;;  %vm67_vm4 = vcmask 259076   ;;  %s141_s28 = smov [#allocation5]  }
  0x14   :  { %v40_v3 = vshrl.u32 %v39_v0, 7  ;;  %v85_v8 = vld [vmem:[%s193_s1] ss:$0 sm:$0xff]  ;;  %vm66_vm3 = vmor %vm65_vm2, %vm64_vm1  ;;  %s76_s2 = sshll.u32 %s141_s28, 4  ;;  %vm61_vm5 = vcmask 261120   ;;  %s77_s2 = int_to_ptr.vmem [resolvable:$true] %s76_s2 }
  0x15   :  { %v50_v6 = vunpack.c.0.s8 %v49_v2  ;;  %35 = vst.msk [vmem:[#allocation5] sm:$0x3] %vm34_vm0, %v85_v8  ;;  %v36_v13 = vld [vmem:[#allocation2] sm:$0xf]  ;;  %vm68_vm6 = vmor %vm67_vm4, %vm66_vm3  ;;  %s112_s1 = scalar_lea.vmem %s77_s2, 96  ;;  %p117_p9 = scmp.lt.s32.totalorder %s77_s2, %s77_s2 }
  0x16   :  { %v41_v4 = vsub.s32 0, %v40_v3  ;;  %v45_v5 = vsub.s32 1, %v40_v3  ;;  %p113_p8 = scmp.ne.s32.totalorder %s77_s2, %s112_s1  ;;  %p118_p10 = scmp.lt.s32.totalorder %s112_s1, %s112_s1 }
  0x17   :  { %v53_v11 = vsub.s32 %v50_v6, %v40_v3 }
  0x18   :  { %v42_v9 = vrot.slane %v37_v7, %v41_v4  ;;  %v46_v10 = vrot.slane %v37_v7, %v45_v5  ;;  %p119_p11 = por %p118_p10, %p117_p9 }
  0x1a   :  { %v47_v12 = vcombine.low %v42_v9, %v46_v10  ;;  %p120_p12 = pnand %p119_p11, %p113_p8 }
  0x1c   :  { %v54_v14 = vrot.slane %v47_v12, %v53_v11 }
  0x1e   :  { %v56_v15 = vadd.f32 %v54_v14, %v36_v13 }
  0x20   :  { %58 = vrot.lane.b32.xlu0 %v56_v15, %s140_s0 }
  0x92   :  { %v59_v16 = vpop.permute.xlu0 %58 }
  0x93   :  { %v60_v17 = vrot.slane %v59_v16, 6 }
  0x95   :  { %v62_v18 = vsel %vm61_vm5, %v60_v17, %v59_v16 }
  0x96   :  { %69 = vst.msk [vmem:[#allocation5] sm:$0x3f] %vm68_vm6, %v62_v18 }
  0x97   :  { %123 = shalt.err (!%p120_p12)
}
  0x98   :  { %s124_s4 = scalar_lea.hbm %s195_s3, 96 }
  0x99   :  { %p125_p13 = scmp.ne.s32.totalorder %s195_s3, %s124_s4  ;;  %p128_p0 = scmp.lt.u32.totalorder %s124_s4, %s195_s3 }
  0x9b   :  { %p130_p1 = pnand %p128_p0, %p125_p13 }
  0x9d   :  { %133 = shalt.err (!%p130_p1)
}
  0x9e   :  { %79 = dma.vmem_to_hbm [thread:$0]  %s77_s2, 96, %s195_s3, [#allocation4]  }
  0x9f   :  { %136 = dma.done.wait [#allocation4], 96  }
  0xa0   :  { %137 = vsyncadd [#allocation4], 4294967200 }
  0xa1   :  { %83 = vsyncpa [#allocation3], 1 }
  0xa2   :  { %84 = vsyncpa [#allocation4], 1 }

// kernel: tpu_custom_call.1
= control target key start
LH: loop header
LB: loop body
LE: loop exit
PB: predicated region body
PF: predicated region fallthrough
CT: control target
= control target key end

     0   :  { %8 = vsyncpa [#allocation3], 0  ;;  %s192_s0 = inlined_call_operand.hbm [shape: f32[2,256], index: 0, kind: input, shape index: {}]   ;;  %s193_s1 = inlined_call_operand.vmem [shape: f32[1,32], index: 1, kind: input, shape index: {}]   ;;  %s194_s2 = inlined_call_operand.vmem [shape: f32[1,256], index: 2, kind: input, shape index: {}]   ;;  %s195_s3 = inlined_call_operand.hbm [shape: f32[2,288], index: 3, kind: output, shape index: {}]  }
   0x1   :  { %9 = vsyncpa [#allocation4], 0  ;;  %s138_s12 = smov [#allocation2]   ;;  %s90_s16 = scalar_lea.hbm %s192_s0, 64 }
   0x2   :  { %s16_s13 = sshll.u32 %s138_s12, 4  ;;  %p91_p0 = scmp.ne.s32.totalorder %s192_s0, %s90_s16  ;;  %s17_s13 = int_to_ptr.vmem [resolvable:$true] %s16_s13 }
   0x3   :  { %p94_p1 = scmp.lt.u32.totalorder %s90_s16, %s192_s0 }
   0x5   :  { %p96_p2 = pnand %p94_p1, %p91_p0 }
   0x7   :  { %99 = shalt.err (!%p96_p2)
}
   0x8   :  { %s100_s21 = scalar_lea.vmem %s17_s13, 64  ;;  %p105_p4 = scmp.lt.s32.totalorder %s17_s13, %s17_s13 }
   0x9   :  { %p101_p3 = scmp.ne.s32.totalorder %s17_s13, %s100_s21  ;;  %p106_p5 = scmp.lt.s32.totalorder %s100_s21, %s100_s21 }
   0xb   :  { %p107_p6 = por %p106_p5, %p105_p4 }
   0xd   :  { %p108_p7 = pnand %p107_p6, %p101_p3 }
   0xf   :  { %111 = shalt.err (!%p108_p7)
}
  0x10   :  { %19 = dma.hbm_to_vmem [thread:$0]  %s192_s0, 64, %s17_s13, [#allocation3]  }
  0x11   :  { %134 = dma.done.wait [#allocation3], 64  }
  0x12   :  { %135 = vsyncadd [#allocation3], 4294967232  ;;  %v39_v0 = vlaneseq  ;;  %v139_v1 = vmov 1983009808   ;;  %vm34_vm0 = vcmask 254976   ;;  %s140_s0 = smov 32  }
  0x13   :  { %v49_v2 = vunpack.c.l.s4 %v139_v1  ;;  %v37_v7 = vld [vmem:[%s194_s2] sm:$0x3]  ;;  %vm64_vm1 = vcmask 1041664   ;;  %vm65_vm2 = vcmask 1043458   ;;  %vm67_vm4 = vcmask 259076   ;;  %s141_s28 = smov [#allocation5]  }
  0x14   :  { %v40_v3 = vshrl.u32 %v39_v0, 7  ;;  %v85_v8 = vld [vmem:[%s193_s1] ss:$0 sm:$0xff]  ;;  %vm66_vm3 = vmor %vm65_vm2, %vm64_vm1  ;;  %s76_s2 = sshll.u32 %s141_s28, 4  ;;  %vm61_vm5 = vcmask 261120   ;;  %s77_s2 = int_to_ptr.vmem [resolvable:$true] %s76_s2 }
  0x15   :  { %v50_v6 = vunpack.c.0.s8 %v49_v2  ;;  %35 = vst.msk [vmem:[#allocation5] sm:$0x3] %vm34_vm0, %v85_v8  ;;  %v36_v13 = vld [vmem:[#allocation2] sm:$0xf]  ;;  %vm68_vm6 = vmor %vm67_vm4, %vm66_vm3  ;;  %s112_s1 = scalar_lea.vmem %s77_s2, 96  ;;  %p117_p9 = scmp.lt.s32.totalorder %s77_s2, %s77_s2 }
  0x16   :  { %v41_v4 = vsub.s32 0, %v40_v3  ;;  %v45_v5 = vsub.s32 1, %v40_v3  ;;  %p113_p8 = scmp.ne.s32.totalorder %s77_s2, %s112_s1  ;;  %p118_p10 = scmp.lt.s32.totalorder %s112_s1, %s112_s1 }
  0x17   :  { %v53_v11 = vsub.s32 %v50_v6, %v40_v3 }
  0x18   :  { %v42_v9 = vrot.slane %v37_v7, %v41_v4  ;;  %v46_v10 = vrot.slane %v37_v7, %v45_v5  ;;  %p119_p11 = por %p118_p10, %p117_p9 }
  0x1a   :  { %v47_v12 = vcombine.low %v42_v9, %v46_v10  ;;  %p120_p12 = pnand %p119_p11, %p113_p8 }
  0x1c   :  { %v54_v14 = vrot.slane %v47_v12, %v53_v11 }
  0x1e   :  { %v56_v15 = vadd.f32 %v54_v14, %v36_v13 }
  0x20   :  { %58 = vrot.lane.b32.xlu0 %v56_v15, %s140_s0 }
  0x92   :  { %v59_v16 = vpop.permute.xlu0 %58 }
  0x93   :  { %v60_v17 = vrot.slane %v59_v16, 6 }
  0x95   :  { %v62_v18 = vsel %vm61_vm5, %v60_v17, %v59_v16 }
  0x96   :  { %69 = vst.msk [vmem:[#allocation5] sm:$0x3f] %vm68_vm6, %v62_v18 }
  0x97   :  { %123 = shalt.err (!%p120_p12)
}
  0x98   :  { %s124_s4 = scalar_lea.hbm %s195_s3, 96 }
  0x99   :  { %p125_p13 = scmp.ne.s32.totalorder %s195_s3, %s124_s4  ;;  %p128_p0 = scmp.lt.u32.totalorder %s124_s4, %s195_s3 }
  0x9b   :  { %p130_p1 = pnand %p128_p0, %p125_p13 }
  0x9d   :  { %133 = shalt.err (!%p130_p1)
}
  0x9e   :  { %79 = dma.vmem_to_hbm [thread:$0]  %s77_s2, 96, %s195_s3, [#allocation4]  }
  0x9f   :  { %136 = dma.done.wait [#allocation4], 96  }
  0xa0   :  { %137 = vsyncadd [#allocation4], 4294967200 }
  0xa1   :  { %83 = vsyncpa [#allocation3], 1 }
  0xa2   :  { %84 = vsyncpa [#allocation4], 1 }

</bundles_post_ra>
